<compile_context>
chip_gen: v7x
topology: tpu7x:2x2x1
jax: 0.10.0
libtpu: 0.0.40
codegen_flags: <defaults>
</compile_context>

<pallas_src>
import math

import jax
import jax.numpy as jnp
from jax.experimental import pallas as pl
from jax.experimental.pallas import tpu as pltpu


# --------------------------------------------------------------------------
# Kernels
# --------------------------------------------------------------------------

def _dot_acc_f32(a, b):
    """MXU matmul with f32 accumulation.

    Operands keep their native dtype (bf16 stays bf16 -> native MXU rate).
    For f32 operands we pin HIGHEST precision so the result is true-f32
    regardless of global matmul-precision flags (both demo f32 paths are
    HBM-bound, so the multi-pass f32 MXU algorithm is not the bottleneck).
    """
    prec = jax.lax.Precision.HIGHEST if a.dtype == jnp.float32 else None
    return jnp.dot(a, b, precision=prec, preferred_element_type=jnp.float32)


def _matmul_scale_relu_kernel(x_ref, w_ref, scale_ref, shift_ref, o_ref):
    """(TM, K) @ (K, TN) on the MXU, then per-column scale + shift and ReLU."""
    acc = _dot_acc_f32(x_ref[...], w_ref[...])
    o_ref[...] = jnp.maximum(acc * scale_ref[...] + shift_ref[...], 0.0
                             ).astype(o_ref.dtype)


def _conv_block_kernel(x_ref, w_ref, scale_ref, shift_ref, o_ref):
    """One block-level Cin contraction for x kept in its original layout.

    x_ref:(TR, Cin, D3)  w_ref:(Cin, TN)  scale/shift:(1, TN)  o_ref:(TR*D3, TN)

    The whole block is transposed on the (otherwise idle) XLU to (TR, D3, Cin),
    flattened to (TR*D3, Cin) and contracted with a single MXU matmul, then one
    full-tile (unmasked) store -- no per-row loop, no repeated weight pushes.
    """
    tr, cin, d3 = x_ref.shape
    xt = jnp.transpose(x_ref[...], (0, 2, 1))        # batched minor-dim transpose (XLU)
    acc = _dot_acc_f32(xt.reshape(tr * d3, cin), w_ref[...])
    o_ref[...] = jnp.maximum(acc * scale_ref[...] + shift_ref[...], 0.0
                             ).astype(o_ref.dtype)


# --------------------------------------------------------------------------
# Generation-aware tuning / VMEM / tiling helpers
# --------------------------------------------------------------------------

def _round_up(x, m):
    return -(-x // m) * m


def _tpu_tuning():
    """VMEM cap + tile targets per TPU generation (branch on VMEM capacity)."""
    try:
        vmem = int(pltpu.get_tpu_info().vmem_capacity_bytes)
    except Exception:          # unknown backend / older jaxlib: be conservative
        vmem = 64 << 20
    if vmem >= (100 << 20):    # v5e / v6e: 128 MiB VMEM per TensorCore
        return {"vmem_cap": 96 << 20, "target_rows": 1024, "target_cols": 512}
    # v7x: 64 MiB per TensorCore -> keep a 48 MiB scoped cap and smaller tiles
    return {"vmem_cap": 48 << 20, "target_rows": 512, "target_cols": 256}


def _padded_bytes(shape, dtype):
    """VMEM bytes of a block including (sublane, lane=128) layout padding."""
    itemsize = jnp.dtype(dtype).itemsize
    dims = list(shape)
    if dims:
        dims[-1] = _round_up(dims[-1], 128)
    if len(dims) >= 2:
        dims[-2] = _round_up(dims[-2], max(8, 32 // itemsize))
    n = itemsize
    for d in dims:
        n *= d
    return n


def _vmem_limit(block_bytes, cap):
    # double-buffered pipeline blocks + headroom, clamped to the generation cap
    return int(min(max(2 * block_bytes + (8 << 20), 32 << 20), cap))


def _fit_row_tile(tile, granule, cap, block_bytes_of):
    """Shrink the row tile until double-buffered padded blocks fit the VMEM cap."""
    while tile > granule and 2 * block_bytes_of(tile) + (8 << 20) > cap:
        new = max(granule, _round_up(max(granule, tile // 2), granule))
        if new >= tile:
            break
        tile = new
    return tile


def _pick_row_tile(rows, target, granule=8):
    """Largest row tile (multiple of `granule`, <= target), preferring >= 2 steps."""
    target = max(granule, (target // granule) * granule)
    if rows <= granule:
        return rows
    if rows <= target:
        half = (rows // 2) // granule * granule
        if half >= granule and rows % half == 0:
            return half
        return rows
    for t in range(target, granule - 1, -granule):
        if rows % t == 0:
            return t
    return target        # ragged last tile; Pallas masks out-of-bounds stores


def _pick_col_tile(n, target=256):
    """Lane-dense output tile: multiple of 256 (MXU width) or 128, else full dim."""
    if n <= target or n % 128 != 0:
        return n
    for g in (256, 128):
        t = (target // g) * g
        while t >= g:
            if n % t == 0:
                return t
            t -= g
    return n


def _ensure_two_steps(rows, tile_r, cols, tile_c, *, r_granule=8, c_granule=128):
    """Guarantee >=2 grid steps when possible (v7x has 2 TensorCores)."""
    if pl.cdiv(rows, tile_r) * pl.cdiv(cols, tile_c) >= 2:
        return tile_r, tile_c
    if rows >= 2 * r_granule:
        return min(tile_r, _round_up(rows // 2, r_granule)), tile_c
    if cols >= 2 * c_granule and cols % c_granule == 0:
        return tile_r, min(tile_c, max(c_granule, (cols // 2 // c_granule) * c_granule))
    return tile_r, tile_c


# --------------------------------------------------------------------------
# pallas_call builders
# --------------------------------------------------------------------------

def _dense_matmul(x2d, w2d, scale_row, shift_row, *, tile_m, tile_n,
                  out_dtype, vmem_cap):
    """out = relu((x2d @ w2d) * scale + shift), tiled (tile_m, tile_n)."""
    M, K = x2d.shape
    N = w2d.shape[1]

    def block_bytes(tm):
        return (_padded_bytes((tm, K), x2d.dtype)
                + _padded_bytes((K, tile_n), w2d.dtype)
                + 2 * _padded_bytes((1, tile_n), jnp.float32)
                + _padded_bytes((tm, tile_n), out_dtype))

    tile_m = _fit_row_tile(tile_m, min(8, tile_m), vmem_cap, block_bytes)
    cost = pl.CostEstimate(
        flops=int(2 * M * K * N), transcendentals=0,
        bytes_accessed=int(x2d.nbytes + w2d.nbytes + scale_row.nbytes
                           + shift_row.nbytes
                           + M * N * jnp.dtype(out_dtype).itemsize))
    return pl.pallas_call(
        _matmul_scale_relu_kernel,
        out_shape=jax.ShapeDtypeStruct((M, N), out_dtype),
        grid_spec=pltpu.PrefetchScalarGridSpec(
            num_scalar_prefetch=0,
            grid=(pl.cdiv(M, tile_m), pl.cdiv(N, tile_n)),
            in_specs=[
                pl.BlockSpec((tile_m, K), lambda i, j: (i, 0)),
                pl.BlockSpec((K, tile_n), lambda i, j: (0, j)),
                pl.BlockSpec((1, tile_n), lambda i, j: (0, j)),
                pl.BlockSpec((1, tile_n), lambda i, j: (0, j)),
            ],
            out_specs=pl.BlockSpec((tile_m, tile_n), lambda i, j: (i, j)),
        ),
        compiler_params=pltpu.CompilerParams(
            dimension_semantics=("parallel", "parallel"),
            vmem_limit_bytes=_vmem_limit(block_bytes(tile_m), vmem_cap)),
        cost_estimate=cost,
    )(x2d, w2d, scale_row, shift_row)


def _conv_block(x3, w2d, scale_row, shift_row, *, tile_r, tile_n,
                out_dtype, vmem_cap):
    """out[r*D3+d, n] = relu(scale[n]*sum_c x3[r,c,d]*w[c,n] + shift[n]).

    x3 stays in its original (R, Cin, D3) HBM layout (no wrapper transpose);
    the Cin/D3 swap happens in-kernel on the XLU (one op per grid step).
    """
    R, Cin, D3 = x3.shape
    N = w2d.shape[1]
    M = R * D3
    granule_r = 8 // math.gcd(D3, 8)     # keeps the out block rows a multiple of 8

    def block_bytes(tr):
        # x block counted with its padded minor dim (D3 -> 128): honest VMEM use.
        return (_padded_bytes((tr, Cin, D3), x3.dtype)
                + _padded_bytes((Cin, tile_n), w2d.dtype)
                + 2 * _padded_bytes((1, tile_n), jnp.float32)
                + _padded_bytes((tr * D3, Cin), x3.dtype)        # transposed copy
                + _padded_bytes((tr * D3, tile_n), out_dtype))

    tile_r = _fit_row_tile(tile_r, granule_r, vmem_cap, block_bytes)
    cost = pl.CostEstimate(
        flops=int(2 * M * Cin * N), transcendentals=0,
        bytes_accessed=int(x3.nbytes + w2d.nbytes + scale_row.nbytes
                           + shift_row.nbytes
                           + M * N * jnp.dtype(out_dtype).itemsize))
    return pl.pallas_call(
        _conv_block_kernel,
        out_shape=jax.ShapeDtypeStruct((M, N), out_dtype),
        grid_spec=pltpu.PrefetchScalarGridSpec(
            num_scalar_prefetch=0,
            grid=(pl.cdiv(R, tile_r), pl.cdiv(N, tile_n)),
            in_specs=[
                pl.BlockSpec((tile_r, Cin, D3), lambda i, j: (i, 0, 0)),
                pl.BlockSpec((Cin, tile_n), lambda i, j: (0, j)),
                pl.BlockSpec((1, tile_n), lambda i, j: (0, j)),
                pl.BlockSpec((1, tile_n), lambda i, j: (0, j)),
            ],
            out_specs=pl.BlockSpec((tile_r * D3, tile_n), lambda i, j: (i, j)),
        ),
        compiler_params=pltpu.CompilerParams(
            dimension_semantics=("parallel", "parallel"),
            vmem_limit_bytes=_vmem_limit(block_bytes(tile_r), vmem_cap)),
        cost_estimate=cost,
    )(x3, w2d, scale_row, shift_row)


# --------------------------------------------------------------------------
# Forward wrapper (GroupConv.forward, eval mode)
# --------------------------------------------------------------------------

# Conservative MXU-vs-HBM critical intensities [flops/byte] used for path choice.
_PACKED_MAX_FLOPS_PER_BYTE = 60.0     # packed path only while clearly HBM-bound (v5e worst case)
_COMPUTE_BOUND_FLOPS_PER_BYTE = 400.0 # above this, a wrapper transpose is cheap


def group_conv_forward(x, conv_w, conv_b, gamma, beta, running_mean,
                       running_var, eps=1e-5, *, out_dtype=jnp.float32,
                       target_rows=None, target_cols=None):
    """x:(B, D1, Cin, D3) -> (B, D1, D3, Cout), matching the PyTorch module (eval).

    * x is consumed in the dtype the producer supplies (f32 or bf16); the
      wrapper never round-trips it through HBM just to change precision.
    * out_dtype may be jnp.bfloat16 to halve output writeback when downstream
      accepts it (default f32 matches the PyTorch module).
    * target_rows / target_cols override the generation-aware tile targets.
    """
    B, D1, Cin, D3 = x.shape
    assert conv_w.shape[1:] == (Cin, 1, 1), (
        "GroupConv uses a 1x1, groups=1 Conv2d; got weight shape "
        f"{conv_w.shape} for in_channels={Cin}")
    Cout = conv_w.shape[0]

    if x.dtype not in (jnp.float32, jnp.bfloat16):
        x = x.astype(jnp.float32)
    cdtype = x.dtype
    out_dtype = jnp.dtype(out_dtype)

    # Fold conv bias + eval-mode BatchNorm into a per-channel (scale, shift)
    # applied in the kernel epilogue:  out = relu(scale * (x @ W) + shift).
    # Keeping scale out of the weight means bf16 weights only round the raw
    # conv weights, not the BN-scaled ones.
    # TODO(synk): training-mode BatchNorm (batch statistics) not implemented.
    inv_std = jax.lax.rsqrt(running_var.astype(jnp.float32) + eps)
    scale = gamma.astype(jnp.float32) * inv_std                               # (Cout,)
    shift = (beta.astype(jnp.float32)
             + (conv_b.astype(jnp.float32)
                - running_mean.astype(jnp.float32)) * scale)                  # (Cout,)
    w2d_f32 = conv_w.reshape(Cout, Cin).T.astype(jnp.float32)                 # (Cin, Cout)
    w2d = w2d_f32.astype(cdtype)       # tiny vs x/out streams; bf16 only if x is bf16
    scale_row = scale[None, :]
    shift_row = shift[None, :]

    tune = _tpu_tuning()
    vmem_cap = tune["vmem_cap"]
    target_rows = int(target_rows or tune["target_rows"])
    target_cols = int(target_cols or tune["target_cols"])

    R = B * D1
    M = R * D3
    x_bytes = R * Cin * D3 * jnp.dtype(cdtype).itemsize
    out_bytes = M * Cout * out_dtype.itemsize

    # ---- D3 == 1: already the right layout, plain lane-dense matmul ----------
    if D3 == 1:
        x2d = x.reshape(R, Cin)
        tile_m = _pick_row_tile(R, target_rows)
        tile_n = _pick_col_tile(Cout, target_cols)
        tile_m, tile_n = _ensure_two_steps(R, tile_m, Cout, tile_n)
        out2d = _dense_matmul(x2d, w2d, scale_row, shift_row,
                              tile_m=tile_m, tile_n=tile_n,
                              out_dtype=out_dtype, vmem_cap=vmem_cap)
        return out2d.reshape(B, D1, D3, Cout)

    # ---- tiny-Cout packed path: lane-dense (D3*Cout)-wide output slab --------
    # x is only reshaped (free) to (R, Cin*D3); a block-diagonal weight makes the
    # output D3*Cout lanes wide (unmasked stores) instead of Cout(<128) masked
    # lanes.  The block-diagonal weight multiplies mostly zeros, so this path is
    # taken only while the D3x-inflated MXU work stays clearly under the HBM
    # roofline (guard added per perf review).
    wbig_bytes = Cin * D3 * D3 * Cout * jnp.dtype(cdtype).itemsize
    inflated_flops = 2.0 * R * (Cin * D3) * (D3 * Cout)
    packed_mem = x_bytes + out_bytes + wbig_bytes
    if (Cout < 128 and wbig_bytes <= (4 << 20)
            and inflated_flops <= _PACKED_MAX_FLOPS_PER_BYTE * packed_mem):
        x2d = x.reshape(R, Cin * D3)                        # free reshape, no cast
        eye = jnp.eye(D3, dtype=jnp.float32)
        w_big = (w2d_f32[:, None, None, :] * eye[None, :, :, None]
                 ).reshape(Cin * D3, D3 * Cout).astype(cdtype)
        scale_big = jnp.tile(scale_row, (1, D3))            # (1, D3*Cout)
        shift_big = jnp.tile(shift_row, (1, D3))
        tile_m = _pick_row_tile(R, target_rows)
        tile_n = _pick_col_tile(D3 * Cout, target_cols)
        tile_m, tile_n = _ensure_two_steps(R, tile_m, D3 * Cout, tile_n)
        out2d = _dense_matmul(x2d, w_big, scale_big, shift_big,
                              tile_m=tile_m, tile_n=tile_n,
                              out_dtype=out_dtype, vmem_cap=vmem_cap)
        return out2d.reshape(B, D1, D3, Cout)

    # ---- general path: x stays in (R, Cin, D3) layout, in-kernel transpose ---
    dense_intensity = (2.0 * M * Cin * Cout
                       / max(1, x_bytes + out_bytes + int(w2d.nbytes)))
    transpose_friendly = (Cin % 8 == 0) and (D3 % 8 == 0)
    if transpose_friendly and dense_intensity <= _COMPUTE_BOUND_FLOPS_PER_BYTE:
        granule_r = 8 // math.gcd(D3, 8)
        tile_r = _pick_row_tile(R, max(granule_r, target_rows // D3),
                                granule=granule_r)
        tile_n = _pick_col_tile(Cout, target_cols)
        tile_r, tile_n = _ensure_two_steps(R, tile_r, Cout, tile_n,
                                           r_granule=granule_r)
        x3 = x.reshape(R, Cin, D3)               # free reshape, no HBM transpose
        try:
            out2d = _conv_block(x3, w2d, scale_row, shift_row,
                                tile_r=tile_r, tile_n=tile_n,
                                out_dtype=out_dtype, vmem_cap=vmem_cap)
            return out2d.reshape(B, D1, D3, Cout)
        except Exception:
            # Mosaic support for batched minor-dim transposes / shape casts can
            # vary across jaxlib versions; fall back to the layout-transposed
            # dense path below rather than failing outright.
            pass

    # ---- fallback / compute-bound path: one wrapper-side transpose -----------
    # (B,D1,Cin,D3) -> (B,D1,D3,Cin): a single XLA transpose; afterwards the
    # kernel is a plain lane-dense (M,Cin)@(Cin,Cout) matmul at full MXU rate.
    xt = jnp.transpose(x, (0, 1, 3, 2)).reshape(M, Cin)
    tile_m = _pick_row_tile(M, target_rows)
    tile_n = _pick_col_tile(Cout, target_cols)
    tile_m, tile_n = _ensure_two_steps(M, tile_m, Cout, tile_n)
    out2d = _dense_matmul(xt, w2d, scale_row, shift_row,
                          tile_m=tile_m, tile_n=tile_n,
                          out_dtype=out_dtype, vmem_cap=vmem_cap)
    return out2d.reshape(B, D1, D3, Cout)


# --------------------------------------------------------------------------
# Pure-JAX reference (mirrors the PyTorch module, eval mode)
# --------------------------------------------------------------------------

def group_conv_reference(x, conv_w, conv_b, gamma, beta, running_mean,
                         running_var, eps=1e-5):
    B, D1, Cin, D3 = x.shape
    Cout = conv_w.shape[0]
    x_perm = jnp.transpose(x.astype(jnp.float32), (0, 2, 3, 1))   # (B, Cin, D3, D1)
    z = jnp.einsum("oc,bchw->bohw", conv_w.reshape(Cout, Cin).astype(jnp.float32),
                   x_perm, precision=jax.lax.Precision.HIGHEST)
    z = z + conv_b[None, :, None, None]
    z = (gamma[None, :, None, None] * (z - running_mean[None, :, None, None])
         / jnp.sqrt(running_var[None, :, None, None] + eps)
         + beta[None, :, None, None])
    z = jnp.maximum(z, 0.0)
    return jnp.transpose(z, (0, 3, 2, 1))                         # (B, D1, D3, Cout)


# --------------------------------------------------------------------------
# Demo / self-test
# --------------------------------------------------------------------------

if __name__ == "__main__":
    def make_inputs(key, B, D1, Cin, D3, Cout, x_dtype=jnp.float32):
        k = jax.random.split(key, 7)
        x = jax.random.normal(k[0], (B, D1, Cin, D3), jnp.float32).astype(x_dtype)
        bound = 1.0 / (Cin ** 0.5)      # PyTorch-default-style init
        conv_w = jax.random.uniform(k[1], (Cout, Cin, 1, 1), jnp.float32, -bound, bound)
        conv_b = jax.random.uniform(k[2], (Cout,), jnp.float32, -bound, bound)
        gamma = jax.random.uniform(k[3], (Cout,), jnp.float32, 0.5, 1.5)
        beta = 0.1 * jax.random.normal(k[4], (Cout,), jnp.float32)
        rmean = 0.1 * jax.random.normal(k[5], (Cout,), jnp.float32)
        rvar = jnp.abs(jax.random.normal(k[6], (Cout,), jnp.float32)) + 0.5
        return (x, conv_w, conv_b, gamma, beta, rmean, rvar)

    key = jax.random.PRNGKey(0)
    k1, k2, k3 = jax.random.split(key, 3)

    # 1) Tiny-channel shapes -> packed lane-dense path (f32, no wrapper cast).
    args1 = make_inputs(k1, 2, 16, 4, 16, 8)             # x: (2, 16, 4, 16)
    out1 = jax.block_until_ready(group_conv_forward(*args1))
    ref1 = group_conv_reference(*args1)
    assert out1.shape == (2, 16, 16, 8), out1.shape
    err1 = float(jnp.max(jnp.abs(out1 - ref1)))
    assert err1 < 2e-3, err1

    # 2) Wider channels -> general path (single in-kernel block transpose +
    #    one MXU matmul per grid step), f32 x.
    args2 = make_inputs(k2, 2, 64, 128, 8, 256)          # x: (2, 64, 128, 8)
    out2 = jax.block_until_ready(group_conv_forward(*args2))
    ref2 = group_conv_reference(*args2)
    assert out2.shape == (2, 64, 8, 256), out2.shape
    err2 = float(jnp.max(jnp.abs(out2 - ref2)))
    assert err2 < 2e-3, err2

    # 3) Producer-supplied bf16 x (no wrapper-side cast): bf16 operands on the
    #    MXU, f32 accumulation, BN scale applied in the f32 epilogue.
    args3 = make_inputs(k3, 2, 32, 128, 8, 128, x_dtype=jnp.bfloat16)
    out3 = jax.block_until_ready(group_conv_forward(*args3))
    ref3 = group_conv_reference(*args3)
    assert out3.shape == (2, 32, 8, 128), out3.shape
    err3 = float(jnp.max(jnp.abs(out3 - ref3)))
    assert err3 < 5e-2, err3

    print("KERNEL_OK")
</pallas_src>

<mosaic_0001>
module attributes {stable_mosaic.version = 11 : i64} {
  func.func @_matmul_scale_relu_kernel(%arg0: i32, %arg1: i32, %arg2: memref<16x64xf32, #tpu.memory_space<vmem>>, %arg3: memref<64x128xf32, #tpu.memory_space<vmem>>, %arg4: memref<1x128xf32, #tpu.memory_space<vmem>>, %arg5: memref<1x128xf32, #tpu.memory_space<vmem>>, %arg6: memref<16x128xf32, #tpu.memory_space<vmem>>) attributes {dimension_semantics = [#tpu.dimension_semantics<parallel>, #tpu.dimension_semantics<parallel>], iteration_bounds = array<i64: 2, 1>, scalar_prefetch = 0 : i64, scratch_operands = 0 : i64, tpu.core_type = #tpu.core_type<tc>, window_params = [{transform_indices = @transform_0, window_bounds = array<i64: 16, 64>}, {transform_indices = @transform_1, window_bounds = array<i64: 64, 128>}, {transform_indices = @transform_2, window_bounds = array<i64: 1, 128>}, {transform_indices = @transform_3, window_bounds = array<i64: 1, 128>}, {transform_indices = @transform_4, window_bounds = array<i64: 16, 128>}]} {
    %c0 = arith.constant 0 : index
    %c0_0 = arith.constant 0 : index
    %0 = vector.load %arg2[%c0, %c0_0] : memref<16x64xf32, #tpu.memory_space<vmem>>, vector<16x64xf32>
    %c0_1 = arith.constant 0 : index
    %c0_2 = arith.constant 0 : index
    %1 = vector.load %arg3[%c0_1, %c0_2] : memref<64x128xf32, #tpu.memory_space<vmem>>, vector<64x128xf32>
    %cst = arith.constant dense<0.000000e+00> : vector<16x128xf32>
    %2 = tpu.matmul %0, %1, %cst {dimension_numbers = #tpu.dot_dimension_numbers<[1], [0], [0], [1], [0, 0, 1, 1], [], []>, precision = #tpu.contract_precision<fp32>} : vector<16x64xf32>, vector<64x128xf32>, vector<16x128xf32> -> vector<16x128xf32>
    %c0_3 = arith.constant 0 : index
    %c0_4 = arith.constant 0 : index
    %3 = vector.load %arg4[%c0_3, %c0_4] : memref<1x128xf32, #tpu.memory_space<vmem>>, vector<1x128xf32>
    %4 = vector.broadcast %3 : vector<1x128xf32> to vector<16x128xf32>
    %5 = arith.mulf %2, %4 : vector<16x128xf32>
    %c0_5 = arith.constant 0 : index
    %c0_6 = arith.constant 0 : index
    %6 = vector.load %arg5[%c0_5, %c0_6] : memref<1x128xf32, #tpu.memory_space<vmem>>, vector<1x128xf32>
    %7 = vector.broadcast %6 : vector<1x128xf32> to vector<16x128xf32>
    %8 = arith.addf %5, %7 : vector<16x128xf32>
    %cst_7 = arith.constant 0.000000e+00 : f32
    %9 = vector.broadcast %cst_7 : f32 to vector<16x128xf32>
    %10 = arith.maximumf %8, %9 : vector<16x128xf32>
    %c0_8 = arith.constant 0 : index
    %c0_9 = arith.constant 0 : index
    %11 = vector.load %arg6[%c0_8, %c0_9] : memref<16x128xf32, #tpu.memory_space<vmem>>, vector<16x128xf32>
    tpu.vector_store %arg6[%c0_8, %c0_9], %10 {strides = array<i32>} : memref<16x128xf32, #tpu.memory_space<vmem>>, vector<16x128xf32>,
    return
  }
  func.func @transform_0(%arg0: i32, %arg1: i32) -> (i32, i32) {
    %c0_i32 = arith.constant 0 : i32
    %c0_i32_0 = arith.constant 0 : i32
    return %arg0, %c0_i32 : i32, i32
  }
  func.func @transform_1(%arg0: i32, %arg1: i32) -> (i32, i32) {
    %c0_i32 = arith.constant 0 : i32
    %c0_i32_0 = arith.constant 0 : i32
    return %c0_i32, %arg1 : i32, i32
  }
  func.func @transform_2(%arg0: i32, %arg1: i32) -> (i32, i32) {
    %c0_i32 = arith.constant 0 : i32
    %c0_i32_0 = arith.constant 0 : i32
    return %c0_i32, %arg1 : i32, i32
  }
  func.func @transform_3(%arg0: i32, %arg1: i32) -> (i32, i32) {
    %c0_i32 = arith.constant 0 : i32
    %c0_i32_0 = arith.constant 0 : i32
    return %c0_i32, %arg1 : i32, i32
  }
  func.func @transform_4(%arg0: i32, %arg1: i32) -> (i32, i32) {
    %c0_i32 = arith.constant 0 : i32
    return %arg0, %arg1 : i32, i32
  }
}

</mosaic_0001>

<bundles_post_ra>
// kernel: tpu_custom_call.1
= control target key start
LH: loop header
LB: loop body
LE: loop exit
PB: predicated region body
PF: predicated region fallthrough
CT: control target
= control target key end

     0   :  { %9 = vsyncpa [#allocation3], 0  ;;  %s1919_s0 = inlined_call_operand.hbm [shape: f32[32,64], index: 0, kind: input, shape index: {}]   ;;  %s1920_s1 = inlined_call_operand.hbm [shape: f32[64,128], index: 1, kind: input, shape index: {}]   ;;  %s1921_s2 = inlined_call_operand.vmem [shape: f32[1,128], index: 2, kind: input, shape index: {}]   ;;  %s1922_s3 = inlined_call_operand.vmem [shape: f32[1,128], index: 3, kind: input, shape index: {}]   ;;  %s1923_s4 = inlined_call_operand.hbm [shape: f32[32,128], index: 4, kind: output, shape index: {}]  }
   0x1   :  { %11 = vsyncpa [#allocation3 + $0x1], 0 }
   0x2   :  { %12 = vsyncpa [#allocation6], 0 }
   0x3   :  { %13 = vsyncpa [#allocation4], 0 }
   0x4   :  { %15 = vsyncpa [#allocation4 + $0x1], 0  ;;  %s1593_s15 = smov 0   ;;  %s1595_s16 = smov 0  }
   0x5   :  { %s1597_s17 = smov 0   ;;  %s1599_s18 = smov 0  }
   0x6   :  { %s1601_s19 = smov 0   ;;  %s1603_s20 = smov 0  }
   0x7 LB: > { %s1035_s21 = sadd.s32 4294967295, %s1559_s20   ;;  %s1036_s22 = sadd.s32 4294967294, %s1559_s20   ;;  %s1559_s20 = sphi %s1603_s20, %s21_s20   ;;  %s1555_s19 = sphi %s1601_s19, %s1947_s19   ;;  %s1551_s18 = sphi %s1599_s18, %s1946_s18   ;;  %s1547_s17 = sphi %s1597_s17, %s1945_s17   ;;  %s1543_s16 = sphi %s1595_s16, %s1944_s16   ;;  %s1539_s15 = sphi %s1593_s15, %s1943_s15  }
   0x8   : > { %p53_p0 = scmp.ne.s32.totalorder %s1543_s16, %s1539_s15  ;;  %p1627_p1 = scmp.eq.s32.totalorder %s1035_s21, 0 }
   0x9   : > { %p1631_p2 = scmp.eq.s32.totalorder %s1035_s21, 1  ;;  %p163_p3 = scmp.eq.s32.totalorder %s1036_s22, 1 }
   0xa   : > { %s1928_s23 = scalar_select %p1627_p1, 1, 0 }
   0xb   : > { %s1929_s24 = scalar_select %p1631_p2, 1, 0 }
   0xc   : > { %p1637_p4 = por %p1627_p1, %p53_p0  ;;  %p1037_p5 = scmp.ge.s32.totalorder %s1559_s20, 1 }
   0xd   : > { %p1642_p6 = por %p163_p3, %p53_p0  ;;  %p170_p7 = scmp.lt.s32.totalorder %s1559_s20, 3 }
   0xe   : > { %s1930_s25 = scalar_select %p1637_p4, 1, 0 }
   0xf   : > { %s1931_s26 = scalar_select %p1642_p6, 1, 0 }
  0x10   : > { %p1647_p8 = pnand %p1037_p5, %p170_p7  ;;  %s1561_s28 = smov [#allocation5]  }
  0x11   : > { %s184_s29 = sshll.u32 %s1561_s28, 4  ;;  %s33_s5 = sadd.s32 1, %s1555_s19  ;;  %s185_s29 = int_to_ptr.vmem [resolvable:$true] %s184_s29 }
  0x12   : > { %s1932_s27 = scalar_select %p1647_p8, 1, 0 }
  0x13   : > { %p1346_p9 = pneg %p1647_p8  ;;  %s1415_s8 = scalar_lea.hbm %s1920_s1, 1024 }
  0x14   : > { %p1416_p12 = scmp.ne.s32.totalorder %s1920_s1, %s1415_s8  ;;  %p1422_p5 = scmp.lt.u32.totalorder %s1415_s8, %s1920_s1 }
  0x15   : > { %p1656_p11 = pnand %p1346_p9, %p1627_p1 }
  0x17   : > { %p1417_p13 = pneg %p1656_p11 }
  0x19   : > { %p1418_p0 = pnand %p1417_p13, %p1416_p12 }
  0x1b   : > { %p1419_p3 = pneg %p1418_p0 }
  0x1d   : > { %p1424_p7 = pnand %p1422_p5, %p1419_p3 }
  0x1f   : > { %1427 = shalt.err (!%p1424_p7)
}
  0x20   : > { %s1428_s13 = scalar_lea.vmem %s185_s29, 1024  ;;  %p1436_p1 = scmp.lt.s32.totalorder %s185_s29, %s185_s29 }
  0x21   : > { %p1429_p9 = scmp.ne.s32.totalorder %s185_s29, %s1428_s13  ;;  %p1437_p4 = scmp.lt.s32.totalorder %s1428_s13, %s1428_s13 }
  0x23   : > { %p1431_p10 = pnand %p1429_p9, %p1417_p13  ;;  %p1438_p8 = por %p1437_p4, %p1436_p1 }
  0x25   : > { %p1432_p6 = pneg %p1431_p10 }
  0x27   : > { %p1439_p2 = pnand %p1438_p8, %p1432_p6 }
  0x29   : > { %1442 = shalt.err (!%p1439_p2)
}
  0x2a   : > { %s1562_s14 = smov 128   ;;  %s1563_s21 = smov 8  }
  0x2b   : > { %1349 = dma.hbm_to_vmem [thread:$0]  (!%p1656_p11), %s1920_s1, 1024, %s185_s29, [#allocation6], %s1562_s14, %s1562_s14, %s1563_s21  }
  0x2c   : > { %p35_p1 = scmp.ge.s32.totalorder %s33_s5, 2  ;;  %s40_s6 = sadd.s32 1, %s1547_s17 }
  0x2d   : > { %p47_p2 = scmp.ne.s32.totalorder %s1547_s17, %s1543_s16  ;;  %p48_p4 = scmp.eq.s32.totalorder %s1559_s20, 0 }
  0x2e   : > { %s1949_s5 = smov (%p35_p1, %s33_s5), 0  ;;  %p1935_p8 = scmp.ne.s32.totalorder %s1929_s24, 0 }
  0x2f   : > { %p1686_p6 = por %p48_p4, %p47_p2  ;;  %s37_s8 = ssub.s32 %s1555_s19, %s1949_s5 }
  0x30   : > { %p1692_p10 = por %p1935_p8, %p47_p2  ;;  %p1359_p12 = scmp.lt.s32.totalorder %s1559_s20, 2 }
  0x31   : > { %p38_p11 = scmp.eq.s32.totalorder %s37_s8, 0  ;;  %s210_s29 = sand.u32 1, %s1547_s17  }
  0x32   : > { %s1042_s9 = sshll.u32 %s210_s29, 4  ;;  %s1056_s11 = sshll.u32 %s1555_s19, 8 }
  0x33   : > { %s1701_s10 = scalar_select %p38_p11, %s1547_s17, %s40_s6  }
  0x34   : > { %s1707_s22 = scalar_lea.hbm %s1919_s0, %s1056_s11  ;;  %s214_s24 = scalar_lea.vmem [#allocation2], %s1042_s9 }
  0x35   : > { %s221_s28 = sshll.u32 %s214_s24, 4  ;;  %p1713_p13 = pnand %p1359_p12, %p1686_p6  ;;  %s1709_s28 = int_to_ptr.vmem [resolvable:$true] %s221_s28 }
  0x36   : > { %s1717_s6 = scalar_lea.sflag [#allocation3], %s210_s29  ;;  %s1443_s12 = scalar_lea.hbm %s1707_s22, 256 }
  0x37   : > { %p1444_p0 = scmp.ne.s32.totalorder %s1707_s22, %s1443_s12  ;;  %p1445_p3 = pneg %p1713_p13 }
  0x38   : > { %s1448_s7 = scalar_lea.hbm %s1919_s0, 512  ;;  %p1449_p9 = scmp.lt.u32.totalorder %s1707_s22, %s1919_s0 }
  0x39   : > { %p1446_p5 = pnand %p1445_p3, %p1444_p0  ;;  %p1450_p1 = scmp.lt.u32.totalorder %s1448_s7, %s1443_s12 }
  0x3a   : > { %p1452_p4 = scmp.lt.u32.totalorder %s1443_s12, %s1707_s22 }
  0x3b   : > { %p1447_p7 = pneg %p1446_p5  ;;  %p1451_p2 = por %p1450_p1, %p1449_p9 }
  0x3d   : > { %p1453_p6 = por %p1452_p4, %p1451_p2 }
  0x3f   : > { %p1454_p8 = pnand %p1453_p6, %p1447_p7 }
  0x41   : > { %1457 = shalt.err (!%p1454_p8)
}
  0x42   : > { %s1458_s29 = scalar_lea.vmem %s1709_s28, 256  ;;  %s1564_s9 = smov [#allocation2]  }
  0x43   : > { %p1459_p12 = scmp.ne.s32.totalorder %s1709_s28, %s1458_s29  ;;  %s1463_s11 = sshll.u32 %s1564_s9, 4  ;;  %s1464_s11 = int_to_ptr.vmem [resolvable:$false] %s1463_s11 }
  0x44   : > { %s1465_s13 = scalar_lea.vmem %s1464_s11, 512  ;;  %p1466_p5 = scmp.lt.s32.totalorder %s1709_s28, %s1464_s11 }
  0x45   : > { %p1461_p11 = pnand %p1459_p12, %p1445_p3  ;;  %p1467_p9 = scmp.lt.s32.totalorder %s1465_s13, %s1458_s29 }
  0x47   : > { %p1462_p0 = pneg %p1461_p11  ;;  %p1468_p1 = por %p1467_p9, %p1466_p5 }
  0x49   : > { %p1469_p2 = pnand %p1468_p1, %p1462_p0 }
  0x4b   : > { %1472 = shalt.err (!%p1469_p2)
}
  0x4c   : > { %1353 = dma.hbm_to_vmem [thread:$0]  (!%p1713_p13), %s1707_s22, 256, %s1709_s28, %s1717_s6, %s1562_s14, %s1562_s14, %s1563_s21  }
  0x4d   : > { %p1938_p3 = scmp.ne.s32.totalorder %s1932_s27, 0 }
  0x4e   : > { %s1751_s12 = sand.u32 (!%p1938_p3), 1, %s1543_s16   ;;  %p1939_p7 = scmp.ne.s32.totalorder (!%p1938_p3), %s1930_s25, 0 }
  0x4f   : > { %233 = sbr.rel (%p1938_p3) target bundleno = 379 (0x17b), region = 36  ;;  %s1046_s7 = sshll.u32 (!%p1938_p3), %s1751_s12, 4 }
  0x50   : > { %s236_s24 = scalar_lea.sflag (!%p1938_p3), [#allocation3], %s1751_s12  ;;  %s239_s8 = scalar_lea.vmem (!%p1938_p3), [#allocation2], %s1046_s7 }
  0x56   : > { %1526 = dma.done.wait (%p1939_p7), %s236_s24, 256  }
  0x57   : > { %1528 = vsyncadd (%p1939_p7), %s236_s24, 4294967040  ;;  %p1940_p13 = scmp.ne.s32.totalorder %s1928_s23, 0 }
  0x59   : > { %1530 = dma.done.wait (%p1940_p13), [#allocation6], 1024  }
  0x5a   : > { %1532 = vsyncadd (%p1940_p13), [#allocation6], 4294966272  ;;  %v284_v0 = vld [vmem:[#allocation5] sm:$0xff]  ;;  %v285_v1 = vld [vmem:[#allocation5 + $0x8] sm:$0xff]  ;;  %vm292_vm0 = vcmask 523264   ;;  %s273_s21 = scalar_lea.vmem [#allocation7], %s1046_s7 }
  0x5b   : > { %v286_v2 = vld [vmem:[#allocation5 + $0x10] sm:$0xff]  ;;  %v300_v3 = vand.u32 4294901760, %v284_v0  ;;  %v303_v4 = vand.u32 4294901760, %v285_v1  ;;  %v287_v5 = vld [vmem:[#allocation5 + $0x18] sm:$0xff]  ;;  %v288_v7 = vld [vmem:[#allocation5 + $0x20] sm:$0xff]  ;;  %s916_s22 = sshll.u32 %s273_s21, 4  ;;  %s1865_s22 = int_to_ptr.vmem [resolvable:$true] %s916_s22 }
  0x5c   : > { %v306_v6 = vand.u32 4294901760, %v286_v2  ;;  %v289_v8 = vld [vmem:[#allocation5 + $0x28] sm:$0xff]  ;;  %v309_v9 = vand.u32 4294901760, %v287_v5  ;;  %v312_v10 = vand.u32 4294901760, %v288_v7  ;;  %v290_v12 = vld [vmem:[#allocation5 + $0x30] sm:$0xff]  ;;  %v291_v15 = vld [vmem:[#allocation5 + $0x38] sm:$0xff] }
  0x5d   : > { %v315_v11 = vand.u32 4294901760, %v289_v8  ;;  %v282_v13 = vld [vmem:[%s239_s8] sm:$0xff]  ;;  %v1765_v14 = vpack.c.bf16 %v303_v4, %v300_v3  ;;  %v283_v16 = vld [vmem:[%s239_s8 + $0x8] sm:$0xff]  ;;  %v318_v19 = vand.u32 4294901760, %v290_v12  ;;  %v1779_v24 = vsub.f32 %v284_v0, %v300_v3  ;;  %s1057_s28 = sshll.u32 %s1551_s18, 8  ;;  %s902_s11 = scalar_lea.sflag [#allocation4], %s1751_s12 }
  0x5e   : > { %v294_v17 = vsel %vm292_vm0, %v282_v13, 0  ;;  %v1768_v18 = vpack.c.bf16 %v309_v9, %v306_v6  ;;  %v297_v20 = vsel %vm292_vm0, %v283_v16, 0  ;;  %v1781_v25 = vsub.f32 %v285_v1, %v303_v4  ;;  %v1049_v16 = vld [vmem:[%s1921_s2] ss:$0 sm:$0xff]  ;;  %s1870_s9 = scalar_lea.hbm %s1923_s4, %s1057_s28  ;;  %s1473_s13 = scalar_lea.vmem %s1865_s22, 256 }
  0x5f   : > { %v1771_v21 = vand.u32 4294901760, %v294_v17  ;;  %1233 = vmatprep.subr.bf16.mxu1 %v1765_v14  ;;  %1281 = vmatprep.subr.bf16.mxu0 %v1765_v14  ;;  %v1775_v22 = vpack.c.bf16 %v315_v11, %v312_v10  ;;  %v1777_v23 = vand.u32 4294901760, %v297_v20  ;;  %v321_v26 = vand.u32 4294901760, %v291_v15  ;;  %p1474_p4 = scmp.ne.s32.totalorder %s1865_s22, %s1473_s13  ;;  %s1565_s18 = smov [#allocation7]  }
  0x60   : > { %1235 = vmatpush3.bf16.msra.mxu1 %v1765_v14  ;;  %1283 = vmatpush3.bf16.msra.mxu0 %v1765_v14  ;;  %v1788_v28 = vsub.f32 %v286_v2, %v306_v6  ;;  %v1790_v29 = vsub.f32 %v287_v5, %v309_v9  ;;  %v395_v30 = vand.u32 4294901760, %v1779_v24  ;;  %v402_v31 = vand.u32 4294901760, %v1781_v25  ;;  %s1477_s7 = sshll.u32 %s1565_s18, 4  ;;  %s1478_s7 = int_to_ptr.vmem [resolvable:$false] %s1477_s7 }
  0x61   : > { %v1786_v27 = vsub.f32 %v294_v17, %v1771_v21  ;;  %1237 = vmatprep.subr.bf16.mxu1 %v1768_v18  ;;  %1285 = vmatprep.subr.bf16.mxu0 %v1768_v18  ;;  %v1797_v32 = vsub.f32 %v297_v20, %v1777_v23  ;;  %v1799_v33 = vsub.f32 %v288_v7, %v312_v10  ;;  %v1050_v20 = vld [vmem:[%s1922_s3] ss:$0 sm:$0xff]  ;;  %p1475_p6 = pnand %p1474_p4, %p1692_p10  ;;  %s1479_s24 = scalar_lea.vmem %s1478_s7, 512 }
  0x62   : > { %v409_v35 = vand.u32 4294901760, %v1788_v28  ;;  %v416_v36 = vand.u32 4294901760, %v1790_v29  ;;  %v396_v37 = vsub.f32 %v1779_v24, %v395_v30  ;;  %v403_v38 = vsub.f32 %v1781_v25, %v402_v31  ;;  %p1480_p12 = scmp.lt.s32.totalorder %s1865_s22, %s1478_s7  ;;  %p1481_p11 = scmp.lt.s32.totalorder %s1479_s24, %s1473_s13 }
  0x63   : > { %v374_v34 = vand.u32 4294901760, %v1786_v27  ;;  %v384_v39 = vand.u32 4294901760, %v1797_v32  ;;  %v1807_v40 = vsub.f32 %v289_v8, %v315_v11  ;;  %v1816_v44 = vpack.c.bf16 %v321_v26, %v318_v19  ;;  %p1476_p8 = pneg %p1475_p6 }
  0x64   : > { %1239 = vmatpush3.bf16.msra.mxu1 %v1768_v18  ;;  %1287 = vmatpush3.bf16.msra.mxu0 %v1768_v18  ;;  %v410_v42 = vsub.f32 %v1788_v28, %v409_v35  ;;  %v417_v43 = vsub.f32 %v1790_v29, %v416_v36  ;;  %v397_v45 = vand.u32 4294901760, %v396_v37  ;;  %v404_v46 = vand.u32 4294901760, %v403_v38  ;;  %p1482_p0 = por %p1481_p11, %p1480_p12 }
  0x65   : > { %v375_v41 = vsub.f32 %v1786_v27, %v374_v34  ;;  %1241 = vmatprep.subr.bf16.mxu1 %v1775_v22  ;;  %1289 = vmatprep.subr.bf16.mxu0 %v1775_v22  ;;  %v423_v47 = vand.u32 4294901760, %v1799_v33  ;;  %v385_v49 = vsub.f32 %v1797_v32, %v384_v39  ;;  %v430_v50 = vand.u32 4294901760, %v1807_v40 }
  0x66   : > { %1191 = vmatprep.mubr.f32.mxu0 %v374_v34  ;;  %v1821_v51 = vsub.f32 %v290_v12, %v318_v19  ;;  %v1296_v52 = vpack.c.bf16 %v402_v31, %v395_v30  ;;  %v411_v53 = vand.u32 4294901760, %v410_v42  ;;  %v418_v54 = vand.u32 4294901760, %v417_v43  ;;  %p1483_p5 = pnand %p1482_p0, %p1476_p8 }
  0x67   : > { %v376_v48 = vand.u32 4294901760, %v375_v41  ;;  %v443_v55 = vsub.f32 %v291_v15, %v321_v26  ;;  %v1248_v56 = vpack.c.bf16 %v404_v46, %v397_v45  ;;  %v424_v57 = vsub.f32 %v1799_v33, %v423_v47 }
  0x68   : > { %1243 = vmatpush3.bf16.msra.mxu1 %v1775_v22  ;;  %1291 = vmatpush3.bf16.msra.mxu0 %v1775_v22  ;;  %v431_v58 = vsub.f32 %v1807_v40, %v430_v50  ;;  %v437_v59 = vand.u32 4294901760, %v1821_v51  ;;  %v386_v61 = vand.u32 4294901760, %v385_v49  ;;  %v1252_v62 = vpack.c.bf16 %v418_v54, %v411_v53 }
  0x69   : > { %1245 = vmatprep.subr.bf16.mxu1 %v1816_v44  ;;  %1293 = vmatprep.subr.bf16.mxu0 %v1816_v44  ;;  %v444_v60 = vand.u32 4294901760, %v443_v55  ;;  %v1300_v63 = vpack.c.bf16 %v416_v36, %v409_v35  ;;  %v425_v0 = vand.u32 4294901760, %v424_v57  ;;  %v1304_v5 = vpack.c.bf16 %v430_v50, %v423_v47 }
  0x6a   : > { %1134 = vmatprep.mubr.f32.mxu1 %v376_v48  ;;  %v432_v1 = vand.u32 4294901760, %v431_v58  ;;  %v438_v2 = vsub.f32 %v1821_v51, %v437_v59  ;;  %v1264_v10 = vpack.c.bf16 %v1781_v25, %v1779_v24  ;;  %v1268_v11 = vpack.c.bf16 %v1790_v29, %v1788_v28 }
  0x6b   : > { %v445_v3 = vsub.f32 %v443_v55, %v444_v60  ;;  %v1308_v9 = vpack.c.bf16 %v444_v60, %v437_v59  ;;  %v1272_v12 = vpack.c.bf16 %v1807_v40, %v1799_v33  ;;  %v1276_v13 = vpack.c.bf16 %v443_v55, %v1821_v51 }
  0x6c   : > { %1247 = vmatpush3.bf16.msra.mxu1 %v1816_v44  ;;  %1295 = vmatpush3.bf16.msra.mxu0 %v1816_v44  ;;  %v1256_v4 = vpack.c.bf16 %v432_v1, %v425_v0  ;;  %v439_v6 = vand.u32 4294901760, %v438_v2 }
  0x6d   : > { %1249 = vmatprep.subr.bf16.mxu1 %v1248_v56  ;;  %1297 = vmatprep.subr.bf16.mxu0 %v1296_v52  ;;  %v446_v7 = vand.u32 4294901760, %v445_v3 }
  0x6f   : > { %1135 = vmatmul.mubr.f32.vlgmr.msra.gmra.mrb[0].mxu1 %v386_v61  ;;  %1192 = vmatmul.mubr.f32.vlgmr.msra.gmra.mrb[0].mxu0 %v384_v39  ;;  %v1260_v8 = vpack.c.bf16 %v446_v7, %v439_v6 }
  0x70   : > { %1251 = vmatpush3.bf16.msra.mxu1 %v1248_v56  ;;  %1299 = vmatpush3.bf16.msra.mxu0 %v1296_v52 }
  0x71   : > { %1253 = vmatprep.subr.bf16.mxu1 %v1252_v62  ;;  %1301 = vmatprep.subr.bf16.mxu0 %v1300_v63 }
  0x72   : > { %1153 = vmatprep.mubr.f32.mxu1 %v1771_v21  ;;  %1210 = vmatprep.mubr.f32.mxu0 %v1771_v21 }
  0x74   : > { %1255 = vmatpush3.bf16.msra.mxu1 %v1252_v62  ;;  %1303 = vmatpush3.bf16.msra.mxu0 %v1300_v63 }
  0x75   : > { %1257 = vmatprep.subr.bf16.mxu1 %v1256_v4  ;;  %1305 = vmatprep.subr.bf16.mxu0 %v1304_v5 }
  0x78   : > { %1259 = vmatpush3.bf16.msra.mxu1 %v1256_v4  ;;  %1307 = vmatpush3.bf16.msra.mxu0 %v1304_v5 }
  0x79   : > { %1261 = vmatprep.subr.bf16.mxu1 %v1260_v8  ;;  %1309 = vmatprep.subr.bf16.mxu0 %v1308_v9 }
  0x7c   : > { %1263 = vmatpush3.bf16.msra.mxu1 %v1260_v8  ;;  %1311 = vmatpush3.bf16.msra.mxu0 %v1308_v9 }
  0x7d   : > { %1265 = vmatprep.subr.bf16.mxu1 %v1264_v10  ;;  %1313 = vmatprep.subr.bf16.mxu0 %v1765_v14 }
  0x7f   : > { %1154 = vmatmul.mubr.f32.vlgmr.msra.gmra.mrb[0].mxu1 %v1777_v23  ;;  %1211 = vmatmul.mubr.f32.vlgmr.msra.gmra.mrb[0].mxu0 %v1777_v23 }
  0x80   : > { %1267 = vmatpush3.bf16.msra.mxu1 %v1264_v10  ;;  %1315 = vmatpush3.bf16.msra.mxu0 %v1765_v14 }
  0x81   : > { %1269 = vmatprep.subr.bf16.mxu1 %v1268_v11  ;;  %1317 = vmatprep.subr.bf16.mxu0 %v1768_v18 }
  0x82   : > { %1172 = vmatprep.mubr.f32.mxu1 %v1786_v27  ;;  %1229 = vmatprep.mubr.f32.mxu0 %v1771_v21 }
  0x84   : > { %1271 = vmatpush3.bf16.msra.mxu1 %v1268_v11  ;;  %1319 = vmatpush3.bf16.msra.mxu0 %v1768_v18 }
  0x85   : > { %1273 = vmatprep.subr.bf16.mxu1 %v1272_v12  ;;  %1321 = vmatprep.subr.bf16.mxu0 %v1775_v22 }
  0x88   : > { %1275 = vmatpush3.bf16.msra.mxu1 %v1272_v12  ;;  %1323 = vmatpush3.bf16.msra.mxu0 %v1775_v22 }
  0x89   : > { %1277 = vmatprep.subr.bf16.mxu1 %v1276_v13  ;;  %1325 = vmatprep.subr.bf16.mxu0 %v1816_v44 }
  0x8c   : > { %1279 = vmatpush3.bf16.msra.mxu1 %v1276_v13  ;;  %1327 = vmatpush3.bf16.msra.mxu0 %v1816_v44 }
  0x8f   : > { %1173 = vmatmul.mubr.f32.vlgmr.msra.gmra.mrb[0].mxu1 %v1797_v32  ;;  %1230 = vmatmul.mubr.f32.vlgmr.msra.gmra.mrb[0].mxu0 %v1777_v23 }
 0x162   : > { %v1174_v14 = vpop.f32.mrb[0].mxu1  ;;  %v1231_v15 = vpop.f32.mrb[0].mxu0 }
 0x163   : > { %v1328_v17 = vadd.f32 %v1231_v15, %v1174_v14  ;;  %v593_v18 = vpop.f32.mrb[1].mxu1  ;;  %v869_v19 = vpop.f32.mrb[1].mxu0 }
 0x164   : > { %v1329_v21 = vadd.f32 %v869_v19, %v593_v18 }
 0x165   : > { %v887_v22 = vmul.f32 %v1328_v17, %v1049_v16 }
 0x166   : > { %v886_v23 = vmul.f32 %v1329_v21, %v1049_v16 }
 0x167   : > { %v896_v24 = vadd.f32 %v1050_v20, %v887_v22 }
 0x168   : > { %v895_v25 = vadd.f32 %v1050_v20, %v886_v23 }
 0x169   : > { %v898_v26 = vmax.f32 %v896_v24, 0.0 }
 0x16a   : > { %v897_v27 = vmax.f32 %v895_v25, 0.0 }
 0x16b   : > { %900 = vst [vmem:[%s273_s21 + $0x8] sm:$0xff] %v898_v26 }
 0x16c   : > { %899 = vst [vmem:[%s273_s21] sm:$0xff] %v897_v27 }
 0x16d   : > { %1486 = shalt.err (!%p1483_p5)
}
 0x16e   : > { %s1487_s8 = scalar_lea.hbm %s1870_s9, 256  ;;  %s1491_s27 = scalar_lea.hbm %s1923_s4, 512 }
 0x16f   : > { %p1488_p9 = scmp.ne.s32.totalorder %s1870_s9, %s1487_s8  ;;  %p1492_p3 = scmp.lt.u32.totalorder %s1870_s9, %s1923_s4 }
 0x170   : > { %p1493_p7 = scmp.lt.u32.totalorder %s1491_s27, %s1487_s8  ;;  %p1495_p4 = scmp.lt.u32.totalorder %s1487_s8, %s1870_s9 }
 0x171   : > { %p1489_p1 = pnand %p1488_p9, %p1692_p10 }
 0x172   : > { %p1494_p13 = por %p1493_p7, %p1492_p3 }
 0x173   : > { %p1490_p2 = pneg %p1489_p1 }
 0x174   : > { %p1496_p6 = por %p1495_p4, %p1494_p13 }
 0x176   : > { %p1497_p8 = pnand %p1496_p6, %p1490_p2 }
 0x178   : > { %1500 = shalt.err (!%p1497_p8)
}
 0x179   : > { %s1566_s28 = smov 128   ;;  %s1567_s6 = smov 8  }
 0x17a   : > { %1344 = dma.vmem_to_hbm [thread:$0]  (%p1692_p10), %s1865_s22, 256, %s1870_s9, %s902_s11, %s1566_s28, %s1566_s28, %s1567_s6  }
 0x17b PF: > { %s931_s29 = sand.u32 1, %s1539_s15   ;;  %p1941_p12 = scmp.ne.s32.totalorder %s1931_s26, 0 }
 0x17c   : > { %p1942_p11 = scmp.ge.s32.totalorder %s1559_s20, 2  ;;  %s932_s13 = scalar_lea.sflag [#allocation4], %s931_s29 }
 0x17e   : > { %p1355_p0 = pnand %p1942_p11, %p1941_p12 }
 0x180   : > { %1534 = dma.done.wait (!%p1355_p0), %s932_s13, 256  }
 0x181   : > { %1536 = vsyncadd (!%p1355_p0), %s932_s13, 4294967040  ;;  %s21_s20 = sadd.s32 1, %s1559_s20   ;;  %s1943_s15 = smov %s1543_s16 }
 0x182   : > { %p18_p5 = scmp.ge.s32.totalorder %s21_s20, 4   ;;  %s1944_s16 = smov %s1547_s17 }
 0x183   : > { %s1945_s17 = smov %s1701_s10  ;;  %s1946_s18 = smov %s1555_s19 }
 0x184   : > { %s1947_s19 = smov %s1949_s5  ;;  %20 = sbr.rel (!%p18_p5) target bundleno = 7 (0x7), region = 92 }
 0x18b   :  { %937 = vsyncpa [#allocation3], 1 }
 0x18c   :  { %939 = vsyncpa [#allocation3 + $0x1], 1 }
 0x18d   :  { %940 = vsyncpa [#allocation6], 1 }
 0x18e   :  { %941 = vsyncpa [#allocation4], 1 }
 0x18f   :  { %943 = vsyncpa [#allocation4 + $0x1], 1 }

</bundles_post_ra>
